<compile_context>
chip_gen: v5e
topology: v5e:2x2
jax: 0.10.0
libtpu: 0.0.40
codegen_flags: <defaults>
</compile_context>

<pallas_src>
import functools
import math

import jax
import jax.numpy as jnp
from jax.experimental import pallas as pl
from jax.experimental.pallas import tpu as pltpu

_LANE = 128
_MIB = 1024 * 1024


def _round_up(x, m):
    return ((x + m - 1) // m) * m


def _best_divisor(n, target, cap):
    """Divisor of n closest (in log-ratio) to `target`, not exceeding `cap`."""
    divs = set()
    i = 1
    while i * i <= n:
        if n % i == 0:
            divs.add(i)
            divs.add(n // i)
        i += 1
    allowed = [d for d in divs if d <= cap] or [1]
    t = max(target, 1)
    return min(allowed, key=lambda d: (abs(math.log(d / t)), -d))


def _vmem_limit_bytes():
    """Generation-aware scoped VMEM limit: ~40 MiB on v7x (64 MiB physical per TC),
    ~80 MiB on v5e/v6e (128 MiB physical)."""
    cap = 128 * _MIB
    try:
        info = pltpu.get_tpu_info()
        cap = int(getattr(info, "vmem_capacity_bytes", cap) or cap)
    except Exception:
        pass
    return min(96 * _MIB, (5 * cap) // 8)


def fuse_head_params(wk, bk, wq, bq, wv, bv, compute_dtype=None):
    """ONE-TIME parameter prep (hoist out of the forward pass):
      * pads the head dim to Hp = multiple of 128 (lane-dense MXU ops),
      * folds the 1/sqrt(H) attention scale into the Q projection,
      * fuses K|Q|V into a single (E, 3*Hp) weight and (1, 3*Hp) f32 bias,
      * optionally casts the fused weight to a narrow MXU dtype (bf16 is profitable
        on v5e, v6e and v7x alike; softmax stays f32 inside the kernel).
    Returns (wqkv, bqkv, head_size)."""
    E, H = wk.shape
    Hp = _round_up(H, _LANE)
    scale = 1.0 / (H ** 0.5)

    def pad_w(w):
        return jnp.pad(w, ((0, 0), (0, Hp - H)))

    def pad_b(b):
        return jnp.pad(b, ((0, Hp - H),))

    wqkv = jnp.concatenate([pad_w(wk), pad_w(wq) * scale, pad_w(wv)], axis=1)  # (E, 3Hp)
    bqkv = jnp.concatenate([pad_b(bk), pad_b(bq) * scale, pad_b(bv)])
    bqkv = bqkv.reshape(1, 3 * Hp).astype(jnp.float32)   # bias added post-accum in f32
    if compute_dtype is not None:
        wqkv = wqkv.astype(compute_dtype)
    return wqkv, bqkv, H


def _head_kernel(*refs, batch_block, seq_len, hp, head_size, causal, has_mask,
                 padded_output):
    if has_mask:
        x_ref, wqkv_ref, bqkv_ref, mask_ref, out_ref = refs
    else:
        x_ref, wqkv_ref, bqkv_ref, out_ref = refs
        mask_ref = None

    bb, T, Hp, H = batch_block, seq_len, hp, head_size
    # MXU operand precision is determined by the (pre-cast) weight dtype.
    mxu_dtype = wqkv_ref.dtype

    # ---- fused QKV projection: one wide MXU matmul over all bb*T rows ----
    # Activation cast happens in-kernel (VALU slack) -> no wrapper-side HBM pass.
    x2 = x_ref[...].astype(mxu_dtype)                                   # (bb*T, E)
    qkv = jnp.dot(x2, wqkv_ref[...],
                  preferred_element_type=jnp.float32) + bqkv_ref[...]   # (bb*T, 3Hp) f32
    qkv = qkv.reshape(bb, T, 3 * Hp)        # sublane-only reshape (T % 8 == 0)

    k = qkv[:, :, 0 * Hp:1 * Hp]
    q = qkv[:, :, 1 * Hp:2 * Hp]            # 1/sqrt(H) already folded into Wq/bq
    v = qkv[:, :, 2 * Hp:3 * Hp]

    # ---- scores: q @ k^T, contracting last dims (no transpose/relayout of k) ----
    scores = jnp.einsum('bqh,bkh->bqk', q.astype(mxu_dtype), k.astype(mxu_dtype),
                        preferred_element_type=jnp.float32)             # (bb, T, T) f32

    if has_mask:
        # Large finite negative BEFORE the row max -> no (-inf - -inf) NaN hazard.
        # (Fully-masked rows give a uniform distribution, unlike PyTorch's NaN.)
        scores = jnp.where(mask_ref[...] != 0, scores, -1e30)
    elif causal:
        row = jax.lax.broadcasted_iota(jnp.int32, (T, T), 0)
        col = jax.lax.broadcasted_iota(jnp.int32, (T, T), 1)
        scores = jnp.where(col <= row, scores, -1e30)

    # ---- softmax over last dim (f32 throughout) ----
    scores = scores - jnp.max(scores, axis=-1, keepdims=True)
    p = jnp.exp(scores)
    denom = jnp.sum(p, axis=-1, keepdims=True)
    inv = pl.reciprocal(denom, approx=True)      # EUP slot, nearly free
    inv = inv * (2.0 - denom * inv)              # single Newton step -> f32-level accuracy
    p = p * inv

    # ---- out = probs @ v ----
    out = jnp.einsum('bqk,bkh->bqh', p.astype(mxu_dtype), v.astype(mxu_dtype),
                     preferred_element_type=jnp.float32)                # (bb, T, Hp) f32

    if padded_output:
        out_ref[...] = out.astype(out_ref.dtype)
    else:
        # Store the H real columns directly (masked store) -- no wrapper-side slice,
        # no extra HBM round trip over the output.
        out_ref[...] = out[:, :, :H].astype(out_ref.dtype)


def head_forward_fused(x, wqkv, bqkv, head_size, mask=None, causal=False,
                       batch_block=None, compute_dtype=None, min_grid_steps=2,
                       padded_output=False, vmem_limit_bytes=None):
    """x: (B, T, E) (kept in its own dtype; cast to the weight dtype inside the kernel).
    wqkv/bqkv: fused params from fuse_head_params. head_size: real H.

    mask: optional (T, T), 0 = masked. causal=True builds the mask in-kernel (no DMA).
    padded_output=True returns the lane-dense (B, T, Hp) slab (consumer folds the
    H-slice, e.g. by zero-padding its weight rows); default writes (B, T, H) directly.
    min_grid_steps=2 keeps at least two "parallel" grid steps so both v7x TensorCores
    get work (costs one ~0.35 us extra step on single-TC v5e/v6e)."""
    B, T, E = x.shape
    H = head_size
    threeHp = wqkv.shape[1]
    Hp = threeHp // 3
    assert T % 8 == 0, f"T={T} must be a multiple of 8 (f32 sublane tiling)"
    assert wqkv.shape[0] == E and Hp % _LANE == 0 and H <= Hp

    if compute_dtype is not None and wqkv.dtype != compute_dtype:
        # Prefer doing this once in fuse_head_params; per-call fallback only.
        wqkv = wqkv.astype(compute_dtype)

    if vmem_limit_bytes is None:
        vmem_limit_bytes = _vmem_limit_bytes()

    xb = jnp.dtype(x.dtype).itemsize
    wb = jnp.dtype(wqkv.dtype).itemsize
    ob = xb
    # Per-batch-element VMEM resident in one grid step:
    per_b = (2 * T * E * xb          # x block (double-buffered)
             + 2 * T * Hp * ob       # out block (double-buffered, lane-padded)
             + T * 3 * Hp * 4        # f32 qkv intermediate
             + 2 * T * T * 4         # f32 scores + probs
             + 3 * T * Hp * wb       # q/k/v copies in MXU dtype
             + T * T * wb            # probs copy in MXU dtype
             + T * Hp * 4)           # f32 out accumulator
    resident = (2 * E * threeHp * wb         # fused weight (double-buffered)
                + 2 * threeHp * 4            # fused bias
                + (2 * T * T * 4 if mask is not None else 0))
    budget = int(0.70 * vmem_limit_bytes) - resident
    bb_bytes = max(1, budget // per_b)

    if batch_block is None:
        target = min(B, bb_bytes)
        if min_grid_steps and min_grid_steps > 1 and B >= min_grid_steps:
            # v7x: keep >= min_grid_steps "parallel" steps so both TCs get work.
            target = min(target, max(1, B // min_grid_steps))
        # Since bb is maximized within the VMEM budget, the MXU row floor
        # (bb*T >= 256) is only violated when B or VMEM force it.
    else:
        target = max(1, min(batch_block, B))
    bb = _best_divisor(B, target, cap=min(B, max(int(bb_bytes), 1)))
    # TODO(synk): for awkward (e.g. prime) B a pl.cdiv grid with a masked short last
    # block would beat rounding to a divisor of B.
    grid = (B // bb,)

    x2 = x.reshape(B * T, E)   # flattened rows for the fused QKV projection

    has_mask = mask is not None
    in_specs = [
        pl.BlockSpec((bb * T, E), lambda i: (i, 0)),      # x rows for this batch block
        pl.BlockSpec((E, threeHp), lambda i: (0, 0)),     # fused Wqkv (resident)
        pl.BlockSpec((1, threeHp), lambda i: (0, 0)),     # fused bias (f32)
    ]
    args = [x2, wqkv, bqkv]
    if has_mask:
        args.append((mask != 0).astype(jnp.int32))        # int mask, no float == 0
        in_specs.append(pl.BlockSpec((T, T), lambda i: (0, 0)))

    out_dim = Hp if padded_output else H
    out_shape = jax.ShapeDtypeStruct((B, T, out_dim), x.dtype)
    out_specs = pl.BlockSpec((bb, T, out_dim), lambda i: (i, 0, 0))

    kernel = functools.partial(_head_kernel, batch_block=bb, seq_len=T, hp=Hp,
                               head_size=H, causal=causal, has_mask=has_mask,
                               padded_output=padded_output)

    return pl.pallas_call(
        kernel,
        out_shape=out_shape,
        grid_spec=pltpu.PrefetchScalarGridSpec(
            num_scalar_prefetch=0,
            grid=grid,
            in_specs=in_specs,
            out_specs=out_specs,
        ),
        compiler_params=pltpu.CompilerParams(
            dimension_semantics=("parallel",),
            vmem_limit_bytes=int(vmem_limit_bytes)),
    )(*args)


def head_forward(x, wk, bk, wq, bq, wv, bv, mask=None, causal=False,
                 batch_block=None, compute_dtype=None, **kwargs):
    """Convenience wrapper matching the original signature. NOTE: this fuses/pads the
    weights every call; for repeated forwards hoist with fuse_head_params(...) once
    and call head_forward_fused(...)."""
    wqkv, bqkv, H = fuse_head_params(wk, bk, wq, bq, wv, bv, compute_dtype=compute_dtype)
    return head_forward_fused(x, wqkv, bqkv, H, mask=mask, causal=causal,
                              batch_block=batch_block, **kwargs)


def _reference(x, wk, bk, wq, bq, wv, bv, mask=None):
    H = wk.shape[1]
    k = x @ wk + bk
    q = x @ wq + bq
    v = x @ wv + bv
    wei = (q @ jnp.swapaxes(k, -2, -1)) * (1.0 / H ** 0.5)
    if mask is not None:
        wei = jnp.where(mask == 0, -jnp.inf, wei)
    wei = jax.nn.softmax(wei, axis=-1)
    return wei @ v


if __name__ == "__main__":
    # Small shapes consistent with the module: n_embd=32, head_size=12 (default arg)
    B, T, E, H = 2, 8, 32, 12

    key = jax.random.PRNGKey(0)
    kx, k1, k2, k3, k4, k5, k6 = jax.random.split(key, 7)

    x = jax.random.normal(kx, (B, T, E), dtype=jnp.float32)

    bound = 1.0 / (E ** 0.5)
    wk = jax.random.uniform(k1, (E, H), minval=-bound, maxval=bound, dtype=jnp.float32)
    bk = jax.random.uniform(k2, (H,), minval=-bound, maxval=bound, dtype=jnp.float32)
    wq = jax.random.uniform(k3, (E, H), minval=-bound, maxval=bound, dtype=jnp.float32)
    bq = jax.random.uniform(k4, (H,), minval=-bound, maxval=bound, dtype=jnp.float32)
    wv = jax.random.uniform(k5, (E, H), minval=-bound, maxval=bound, dtype=jnp.float32)
    bv = jax.random.uniform(k6, (H,), minval=-bound, maxval=bound, dtype=jnp.float32)

    # One-time hoisted parameter prep (f32 and bf16 variants).
    wqkv, bqkv, Hs = fuse_head_params(wk, bk, wq, bq, wv, bv)
    wqkv_bf, bqkv_bf, _ = fuse_head_params(wk, bk, wq, bq, wv, bv,
                                           compute_dtype=jnp.bfloat16)

    ref = _reference(x, wk, bk, wq, bq, wv, bv, mask=None)
    tri = jnp.tril(jnp.ones((T, T), dtype=jnp.float32))
    ref_c = _reference(x, wk, bk, wq, bq, wv, bv, mask=tri)

    # 1) no mask, hoisted params, direct (B,T,H) output (no wrapper slice)
    out = jax.block_until_ready(head_forward_fused(x, wqkv, bqkv, Hs))
    assert out.shape == (B, T, H) and out.dtype == x.dtype
    assert jnp.allclose(out, ref, atol=1e-5, rtol=1e-5), "mismatch (no mask)"

    # 2) causal mask generated in-kernel (no (T,T) mask DMA)
    out_c = jax.block_until_ready(head_forward_fused(x, wqkv, bqkv, Hs, causal=True))
    assert jnp.allclose(out_c, ref_c, atol=1e-5, rtol=1e-5), "mismatch (causal)"

    # 3) explicit mask path (int32 mask DMA'd to VMEM)
    out_m = jax.block_until_ready(head_forward_fused(x, wqkv, bqkv, Hs, mask=tri))
    assert jnp.allclose(out_m, ref_c, atol=1e-5, rtol=1e-5), "mismatch (explicit mask)"

    # 4) bf16 MXU operands (profitable on v5e/v6e/v7x); x cast in-kernel, output f32
    out_bf = jax.block_until_ready(head_forward_fused(x, wqkv_bf, bqkv_bf, Hs))
    assert out_bf.dtype == x.dtype
    assert jnp.allclose(out_bf, ref, atol=5e-2, rtol=5e-2), "mismatch (bf16)"

    # 5) padded lane-dense output path (consumer folds the H-slice)
    out_p = jax.block_until_ready(
        head_forward_fused(x, wqkv, bqkv, Hs, padded_output=True))
    assert out_p.shape == (B, T, 128)
    assert jnp.allclose(out_p[..., :H], ref, atol=1e-5, rtol=1e-5), "mismatch (padded)"

    # 6) convenience wrapper (per-call fusion) still matches
    out_w = jax.block_until_ready(head_forward(x, wk, bk, wq, bq, wv, bv))
    assert jnp.allclose(out_w, ref, atol=1e-5, rtol=1e-5), "mismatch (convenience)"

    print("KERNEL_OK")
</pallas_src>

<mosaic_0001>
module attributes {stable_mosaic.version = 11 : i64} {
  func.func @_head_kernel(%arg0: i32, %arg1: memref<8x32xf32, #tpu.memory_space<vmem>>, %arg2: memref<32x384xf32, #tpu.memory_space<vmem>>, %arg3: memref<1x384xf32, #tpu.memory_space<vmem>>, %arg4: memref<1x8x12xf32, #tpu.memory_space<vmem>>) attributes {dimension_semantics = [#tpu.dimension_semantics<parallel>], iteration_bounds = array<i64: 2>, scalar_prefetch = 0 : i64, scratch_operands = 0 : i64, tpu.core_type = #tpu.core_type<tc>, window_params = [{transform_indices = @transform_0, window_bounds = array<i64: 8, 32>}, {pipeline_mode = #tpu.pipeline_mode<synchronous>, transform_indices = @transform_1, window_bounds = array<i64: 32, 384>}, {pipeline_mode = #tpu.pipeline_mode<synchronous>, transform_indices = @transform_2, window_bounds = array<i64: 1, 384>}, {transform_indices = @transform_3, window_bounds = array<i64: 1, 8, 12>}]} {
    %c0 = arith.constant 0 : index
    %c0_0 = arith.constant 0 : index
    %0 = vector.load %arg1[%c0, %c0_0] : memref<8x32xf32, #tpu.memory_space<vmem>>, vector<8x32xf32>
    %c0_1 = arith.constant 0 : index
    %c0_2 = arith.constant 0 : index
    %1 = vector.load %arg2[%c0_1, %c0_2] : memref<32x384xf32, #tpu.memory_space<vmem>>, vector<32x384xf32>
    %cst = arith.constant dense<0.000000e+00> : vector<8x384xf32>
    %2 = tpu.matmul %0, %1, %cst {dimension_numbers = #tpu.dot_dimension_numbers<[1], [0], [0], [1], [0, 0, 1, 1], [], []>} : vector<8x32xf32>, vector<32x384xf32>, vector<8x384xf32> -> vector<8x384xf32>
    %c0_3 = arith.constant 0 : index
    %c0_4 = arith.constant 0 : index
    %3 = vector.load %arg3[%c0_3, %c0_4] : memref<1x384xf32, #tpu.memory_space<vmem>>, vector<1x384xf32>
    %4 = vector.broadcast %3 : vector<1x384xf32> to vector<8x384xf32>
    %5 = arith.addf %2, %4 : vector<8x384xf32>
    %6 = vector.shape_cast %5 : vector<8x384xf32> to vector<1x8x384xf32>
    %7 = vector.extract_strided_slice %6 {offsets = [0, 0, 0], sizes = [1, 8, 128], strides = [1, 1, 1]} : vector<1x8x384xf32> to vector<1x8x128xf32>
    %8 = vector.extract_strided_slice %6 {offsets = [0, 0, 128], sizes = [1, 8, 128], strides = [1, 1, 1]} : vector<1x8x384xf32> to vector<1x8x128xf32>
    %9 = vector.extract_strided_slice %6 {offsets = [0, 0, 256], sizes = [1, 8, 128], strides = [1, 1, 1]} : vector<1x8x384xf32> to vector<1x8x128xf32>
    "tpu.trace_start"() <{level = 10 : i32, message = "bqh,bkh->bqk"}> : () -> ()
    %cst_5 = arith.constant dense<0.000000e+00> : vector<1x8x8xf32>
    %10 = tpu.matmul %8, %7, %cst_5 {dimension_numbers = #tpu.dot_dimension_numbers<[2], [2], [1], [1], [0, 0, 0, 1, 1, 1], [0], [0]>} : vector<1x8x128xf32>, vector<1x8x128xf32>, vector<1x8x8xf32> -> vector<1x8x8xf32>
    "tpu.trace_stop"() : () -> ()
    %cst_6 = arith.constant dense<0xFF800000> : vector<1x8xf32>
    %11 = vector.multi_reduction <maximumf>, %10, %cst_6 [2] : vector<1x8x8xf32> to vector<1x8xf32>
    %12 = vector.shape_cast %11 : vector<1x8xf32> to vector<1x8x1xf32>
    %13 = vector.broadcast %12 : vector<1x8x1xf32> to vector<1x8x8xf32>
    %14 = arith.subf %10, %13 : vector<1x8x8xf32>
    %15 = math.exp %14 : vector<1x8x8xf32>
    %cst_7 = arith.constant dense<0.000000e+00> : vector<1x8xf32>
    %16 = vector.multi_reduction <add>, %15, %cst_7 [2] : vector<1x8x8xf32> to vector<1x8xf32>
    %17 = vector.shape_cast %16 : vector<1x8xf32> to vector<1x8x1xf32>
    %18 = tpu.reciprocal %17 {approx = true} : vector<1x8x1xf32> -> vector<1x8x1xf32>
    %19 = arith.mulf %17, %18 : vector<1x8x1xf32>
    %cst_8 = arith.constant 2.000000e+00 : f32
    %20 = vector.broadcast %cst_8 : f32 to vector<1x8x1xf32>
    %21 = arith.subf %20, %19 : vector<1x8x1xf32>
    %22 = arith.mulf %18, %21 : vector<1x8x1xf32>
    %23 = vector.broadcast %22 : vector<1x8x1xf32> to vector<1x8x8xf32>
    %24 = arith.mulf %15, %23 : vector<1x8x8xf32>
    "tpu.trace_start"() <{level = 10 : i32, message = "bqk,bkh->bqh"}> : () -> ()
    %cst_9 = arith.constant dense<0.000000e+00> : vector<1x8x128xf32>
    %25 = tpu.matmul %24, %9, %cst_9 {dimension_numbers = #tpu.dot_dimension_numbers<[2], [1], [1], [2], [0, 0, 0, 1, 1, 2], [0], [0]>} : vector<1x8x8xf32>, vector<1x8x128xf32>, vector<1x8x128xf32> -> vector<1x8x128xf32>
    "tpu.trace_stop"() : () -> ()
    %26 = vector.extract_strided_slice %25 {offsets = [0, 0, 0], sizes = [1, 8, 12], strides = [1, 1, 1]} : vector<1x8x128xf32> to vector<1x8x12xf32>
    %c0_10 = arith.constant 0 : index
    %c0_11 = arith.constant 0 : index
    %c0_12 = arith.constant 0 : index
    %27 = vector.load %arg4[%c0_10, %c0_11, %c0_12] : memref<1x8x12xf32, #tpu.memory_space<vmem>>, vector<1x8x12xf32>
    tpu.vector_store %arg4[%c0_10, %c0_11, %c0_12], %26 {strides = array<i32>} : memref<1x8x12xf32, #tpu.memory_space<vmem>>, vector<1x8x12xf32>,
    return
  }
  func.func @transform_0(%arg0: i32) -> (i32, i32) {
    %c0_i32 = arith.constant 0 : i32
    %c0_i32_0 = arith.constant 0 : i32
    return %arg0, %c0_i32 : i32, i32
  }
  func.func @transform_1(%arg0: i32) -> (i32, i32) {
    %c0_i32 = arith.constant 0 : i32
    %c0_i32_0 = arith.constant 0 : i32
    %c0_i32_1 = arith.constant 0 : i32
    return %c0_i32, %c0_i32_0 : i32, i32
  }
  func.func @transform_2(%arg0: i32) -> (i32, i32) {
    %c0_i32 = arith.constant 0 : i32
    %c0_i32_0 = arith.constant 0 : i32
    %c0_i32_1 = arith.constant 0 : i32
    return %c0_i32, %c0_i32_0 : i32, i32
  }
  func.func @transform_3(%arg0: i32) -> (i32, i32, i32) {
    %c0_i32 = arith.constant 0 : i32
    %c0_i32_0 = arith.constant 0 : i32
    %c0_i32_1 = arith.constant 0 : i32
    return %arg0, %c0_i32, %c0_i32_0 : i32, i32, i32
  }
}

</mosaic_0001>

<bundles_post_ra>
// kernel: tpu_custom_call.1
= control target key start
LH: loop header
LB: loop body
LE: loop exit
PB: predicated region body
PF: predicated region fallthrough
CT: control target
= control target key end

     0   :  { %8 = vsyncpa [#allocation3], 0  ;;  %s903_s0 = inlined_call_operand.hbm [shape: f32[16,32], index: 0, kind: input, shape index: {}]   ;;  %s904_s1 = inlined_call_operand.hbm [shape: f32[32,384], index: 1, kind: input, shape index: {}]   ;;  %s905_s2 = inlined_call_operand.hbm [shape: f32[1,384], index: 2, kind: input, shape index: {}]   ;;  %s906_s3 = inlined_call_operand.hbm [shape: f32[2,8,12], index: 3, kind: output, shape index: {}]  }
   0x1   :  { %10 = vsyncpa [#allocation3 + $0x1], 0 }
   0x2   :  { %11 = vsyncpa [#allocation6], 0 }
   0x3   :  { %12 = vsyncpa [#allocation4], 0 }
   0x4   :  { %14 = vsyncpa [#allocation4 + $0x1], 0  ;;  %s748_s12 = smov 0   ;;  %s750_s13 = smov 0  }
   0x5   :  { %s752_s14 = smov 0   ;;  %s754_s15 = smov 0  }
   0x6 LB: > { %s130_s18 = sshll.u32 %s904_s1, 4  ;;  %s772_s19 = sadd.s32 4294967295, %s722_s15   ;;  %s722_s15 = sphi %s754_s15, %s917_s15   ;;  %s718_s14 = sphi %s752_s14, %s916_s14   ;;  %s714_s13 = sphi %s750_s13, %s915_s13   ;;  %s710_s12 = sphi %s748_s12, %s914_s12   ;;  %s131_s18 = int_to_ptr.hbm [resolvable:$true] %s130_s18 }
   0x7   : > { %p470_p0 = scmp.ge.s32.totalorder %s722_s15, 1  ;;  %p41_p1 = scmp.eq.s32.totalorder %s772_s19, 0 }
   0x8   : > { %p119_p2 = scmp.lt.s32.totalorder %s722_s15, 3  ;;  %s724_s21 = smov [#allocation5]  }
   0x9   : > { %s132_s22 = sshll.u32 %s724_s21, 4  ;;  %s145_s25 = sshll.u32 %s905_s2, 4  ;;  %s133_s22 = int_to_ptr.vmem [resolvable:$true] %s132_s22  ;;  %s146_s25 = int_to_ptr.hbm [resolvable:$true] %s145_s25 }
   0xa   : > { %p777_p3 = pnand %p470_p0, %p119_p2  ;;  %s725_s26 = smov [#allocation7]  }
   0xb   : > { %s147_s27 = sshll.u32 %s725_s26, 4  ;;  %s726_s28 = smov 384   ;;  %s148_s27 = int_to_ptr.vmem [resolvable:$true] %s147_s27 }
   0xc   : > { %p501_p4 = pneg %p777_p3  ;;  %s727_s29 = smov 24  }
   0xd   : > { %s469_s30 = sadd.s32 4294967294, %s722_s15   ;;  %s791_s4 = sadd.s32 1, %s722_s15  }
   0xe   : > { %p502_p6 = pnand %p501_p4, %p41_p1  ;;  %s24_s5 = ssub.s32 %s722_s15, %s791_s4 }
   0xf   : > { %s27_s6 = sadd.s32 1, %s718_s14  ;;  %p25_p7 = scmp.eq.s32.totalorder %s24_s5, 0 }
  0x10   : > { %504 = dma.hbm_to_vmem [thread:$0]  (!%p502_p6), %s131_s18, 1536, %s133_s22, [#allocation6], %s726_s28, %s726_s28, %s727_s29  }
  0x11   : > { %507 = dma.hbm_to_vmem [thread:$0]  (!%p502_p6), %s146_s25, 48, %s148_s27, [#allocation6]  }
  0x12   : > { %p34_p8 = scmp.ne.s32.totalorder %s718_s14, %s714_s13  ;;  %p35_p9 = scmp.eq.s32.totalorder %s722_s15, 0 }
  0x13   : > { %p40_p10 = scmp.ne.s32.totalorder %s714_s13, %s710_s12  ;;  %p106_p13 = scmp.eq.s32.totalorder %s772_s19, 1 }
  0x14   : > { %s802_s7 = scalar_select %p25_p7, %s718_s14, %s27_s6  }
  0x15   : > { %p804_p11 = por %p35_p9, %p34_p8  ;;  %p810_p12 = por %p41_p1, %p40_p10 }
  0x16   : > { %p112_p0 = scmp.eq.s32.totalorder %s469_s30, 1  ;;  %p518_p2 = scmp.lt.s32.totalorder %s722_s15, 2 }
  0x17   : > { %s158_s10 = sand.u32 1, %s718_s14   ;;  %p817_p4 = por %p106_p13, %p34_p8 }
  0x18   : > { %p821_p6 = por %p112_p0, %p40_p10  ;;  %s474_s17 = sshll.u32 %s158_s10, 3 }
  0x19   : > { %s475_s18 = sshll.u32 %s722_s15, 3  ;;  %s162_s24 = scalar_lea.vmem [#allocation2], %s474_s17 }
  0x1a   : > { %s166_s23 = scalar_lea.hbm %s903_s0, %s475_s18  ;;  %s170_s25 = sshll.u32 %s162_s24, 4  ;;  %s171_s25 = int_to_ptr.vmem [resolvable:$true] %s170_s25 }
  0x1b   : > { %s168_s26 = sshll.u32 %s166_s23, 4  ;;  %p831_p7 = pnand %p518_p2, %p804_p11  ;;  %s169_s26 = int_to_ptr.hbm [resolvable:$true] %s168_s26 }
  0x1c   : > { %s159_s28 = scalar_lea.sflag [#allocation3], %s158_s10  ;;  %s622_s29 = sshra.s32 %s169_s26, 4  ;;  %s623_s29 = int_to_ptr.hbm [resolvable:$true] %s622_s29 }
  0x1d   : > { %s624_s30 = scalar_lea.hbm %s623_s29, 8  ;;  %p626_p9 = pneg %p831_p7 }
  0x1e   : > { %p625_p8 = scmp.ne.s32.totalorder %s623_s29, %s624_s30  ;;  %s629_s17 = scalar_lea.hbm %s903_s0, 16 }
  0x1f   : > { %p630_p11 = scmp.lt.s32.totalorder %s623_s29, %s903_s0  ;;  %p631_p0 = scmp.lt.s32.totalorder %s629_s17, %s624_s30 }
  0x20   : > { %p627_p10 = pnand %p626_p9, %p625_p8 }
  0x21   : > { %p632_p2 = por %p631_p0, %p630_p11 }
  0x22   : > { %p628_p13 = pneg %p627_p10 }
  0x24   : > { %p633_p5 = pnand %p632_p2, %p628_p13 }
  0x26   : > { %636 = shalt.err (!%p633_p5)
}
  0x27   : > { %511 = dma.hbm_to_vmem [thread:$0]  (!%p831_p7), %s169_s26, 128, %s171_s25, %s159_s28  }
  0x28   : > { %179 = sbr.rel (%p777_p3) target bundleno = 714 (0x2ca), region = 32  ;;  %s848_s10 = sand.u32 (!%p777_p3), 1, %s714_s13  }
  0x29   : > { %s477_s21 = sshll.u32 (!%p777_p3), %s848_s10, 3  ;;  %s182_s22 = scalar_lea.sflag (!%p777_p3), [#allocation3], %s848_s10 }
  0x2a   : > { %s185_s23 = scalar_lea.vmem (!%p777_p3), [#allocation2], %s477_s21 }
  0x2d   : > { %697 = dma.done.wait (%p810_p12), %s182_s22, 128  }
  0x2e   : > { %699 = vsyncadd (%p810_p12), %s182_s22, 4294967168 }
  0x2f   : > { %701 = dma.done.wait (%p41_p1), [#allocation6], 1584  }
  0x30   : > { %703 = vsyncadd (%p41_p1), [#allocation6], 4294965712  ;;  %v229_v0 = vld [vmem:[#allocation5 + $0x48] sm:$0xff]  ;;  %v226_v1 = vld [vmem:[#allocation5 + $0x30] sm:$0xff]  ;;  %vm240_vm0 = vcmask 261120   ;;  %vm324_vm1 = vcmask 64512  }
  0x31   : > { %v230_v2 = vld [vmem:[#allocation5 + $0x50] sm:$0xff]  ;;  %256 = vmatpush.msra.mxu0 %v229_v0  ;;  %v227_v3 = vld [vmem:[#allocation5 + $0x38] sm:$0xff]  ;;  %v224_v5 = vld [vmem:[#allocation5 + $0x20] sm:$0xff]  ;;  %s486_s20 = sshll.u32 %s772_s19, 3  ;;  %s218_s26 = scalar_lea.vmem [#allocation8], %s477_s21  ;;  %vm362_vm2 = vcmask 97280  }
  0x32   : > { %276 = vmatpush.msra.mxu1 %v230_v2  ;;  %v223_v4 = vld [vmem:[#allocation5 + $0x18] sm:$0xff]  ;;  %v220_v6 = vld [vmem:[#allocation5] sm:$0xff]  ;;  %v221_v7 = vld [vmem:[#allocation5 + $0x8] sm:$0xff]  ;;  %s375_s25 = scalar_lea.hbm %s906_s3, %s486_s20  ;;  %s377_s27 = sshll.u32 %s218_s26, 4  ;;  %s378_s27 = int_to_ptr.vmem [resolvable:$true] %s377_s27 }
  0x33   : > { %257 = vmatpush.msra.mxu0 %v226_v1  ;;  %v219_v8 = vld [vmem:[%s185_s23] sm:$0xff]  ;;  %v232_v9 = vld [vmem:[#allocation7] sm:$0x7]  ;;  %v225_v18 = vld [vmem:[#allocation5 + $0x28] sm:$0xff]  ;;  %s379_s28 = sshll.u32 %s375_s25, 4  ;;  %s365_s29 = scalar_lea.sflag [#allocation4], %s848_s10  ;;  %s380_s28 = int_to_ptr.hbm [resolvable:$true] %s379_s28 }
  0x34   : > { %277 = vmatpush.msra.mxu1 %v227_v3  ;;  %v234_v10 = vperm.slane %v232_v9, 0  ;;  %v235_v11 = vperm.slane %v232_v9, 1  ;;  %v231_v16 = vld [vmem:[#allocation5 + $0x58] sm:$0xff]  ;;  %v228_v17 = vld [vmem:[#allocation5 + $0x40] sm:$0xff]  ;;  %v222_v21 = vld [vmem:[#allocation5 + $0x10] sm:$0xff]  ;;  %v236_v27 = vperm.slane %v232_v9, 2 }
  0x35   : > { %258 = vmatpush.msra.mxu0 %v223_v4  ;;  %296 = vmatpush.msra.mxu2 %v231_v16  ;;  %s666_s30 = sshra.s32 %s380_s28, 4  ;;  %s672_s17 = scalar_lea.hbm %s906_s3, 16  ;;  %s667_s30 = int_to_ptr.hbm [resolvable:$true] %s666_s30 }
  0x36   : > { %278 = vmatpush.msra.mxu1 %v224_v5  ;;  %s668_s5 = scalar_lea.hbm %s667_s30, 8  ;;  %p673_p12 = scmp.lt.s32.totalorder %s667_s30, %s906_s3 }
  0x37   : > { %259 = vmatpush.msra.mxu0 %v220_v6  ;;  %297 = vmatpush.msra.mxu2 %v228_v17  ;;  %p669_p1 = scmp.ne.s32.totalorder %s667_s30, %s668_s5  ;;  %p674_p7 = scmp.lt.s32.totalorder %s672_s17, %s668_s5 }
  0x38   : > { %279 = vmatpush.msra.mxu1 %v221_v7  ;;  %481 = vmatmul.msk.f32.vlgmr.msra.gmra.mxu0 %vm240_vm0, %v219_v8 }
  0x39   : > { %482 = vmatmul.msk.f32.vlgmr.msra.gmra.mxu1 %vm240_vm0, %v219_v8  ;;  %298 = vmatpush.msra.mxu2 %v225_v18  ;;  %p670_p3 = pnand %p669_p1, %p817_p4  ;;  %p675_p8 = por %p674_p7, %p673_p12 }
  0x3b   : > { %299 = vmatpush.msra.mxu2 %v222_v21  ;;  %p671_p5 = pneg %p670_p3 }
  0x3c   : > { %483 = vmatmul.msk.f32.vlgmr.msra.gmra.mxu2 %vm240_vm0, %v219_v8 }
  0x3d   : > { %p676_p9 = pnand %p675_p8, %p671_p5 }
  0xb5   : > { %v261_v12 = vpop.f32.mrf.mxu0 }
  0xb6   : > { %v281_v13 = vpop.f32.mrf.mxu1  ;;  %v262_v14 = vadd.f32 %v261_v12, %v234_v10 }
  0xb7   : > { %v282_v15 = vadd.f32 %v281_v13, %v235_v11 }
  0xb8   : > { %319 = vmatpush.xpose.msra.mxu3 %v262_v14 }
  0xbb   : > { %320 = vmatmul.f32.vlgmr.msra.gmra.mxu3 %v282_v15 }
  0xbf   : > { %v301_v28 = vpop.f32.mrf.mxu2 }
  0xc0   : > { %v302_v29 = vadd.f32 %v301_v28, %v236_v27 }
  0xc2   : > { %357 = vmatpush.msrb.mxu3 %v302_v29 }
 0x13e   : > { %v321_v19 = vpop.f32.mrf.mxu3 }
 0x13f   : > { %v325_v20 = vsel %vm324_vm1, %v321_v19, -inf }
 0x140   : > { %326 = vmax.xlane.f32.xlu0 %v325_v20 }
 0x1b3   : > { %v327_v22 = vpop.xlane.xlu0 %326 }
 0x1b4   : > { %v328_v23 = vsub.f32 %v321_v19, %v327_v22 }
 0x1b6   : > { %v329_v24 = vmul.f32 1.442695, %v328_v23 }
 0x1b8   : > { %558 = vpow2.f32 %v329_v24 }
 0x1be   : > { %v559_v25 = vpop.eup %558 }
 0x1bf   : > { %v331_v26 = vsel %vm324_vm1, %v559_v25, 0.0 }
 0x1c0   : > { %332 = vadd.xlane.f32.xlu0 %v331_v26 }
 0x233   : > { %v333_v30 = vpop.xlane.xlu0 %332 }
 0x234   : > { %560 = vrcp.f32 %v333_v30 }
 0x23a   : > { %v561_v31 = vpop.eup %560 }
 0x23b   : > { %v335_v32 = vmul.f32 %v561_v31, %v333_v30 }
 0x23d   : > { %v336_v33 = vsub.f32 2.0, %v335_v32 }
 0x23f   : > { %v337_v34 = vmul.f32 %v561_v31, %v336_v33 }
 0x241   : > { %v338_v35 = vmul.f32 %v559_v25, %v337_v34 }
 0x243   : > { %484 = vmatmul.msk.f32.vlgmr.msrb.gmra.mxu3 %vm324_vm1, %v338_v35 }
 0x2c6   : > { %v359_v36 = vpop.f32.mrf.mxu3 }
 0x2c7   : > { %363 = vst.msk [vmem:[%s218_s26] sm:$0xff] %vm362_vm2, %v359_v36 }
 0x2c8   : > { %679 = shalt.err (!%p676_p9)
}
 0x2c9   : > { %499 = dma.vmem_to_hbm [thread:$0]  (%p817_p4), %s378_s27, 128, %s380_s28, %s365_s29  }
 0x2ca PF: > { %s391_s10 = sand.u32 1, %s710_s12   ;;  %p913_p10 = scmp.ge.s32.totalorder %s722_s15, 2 }
 0x2cb   : > { %s392_s21 = scalar_lea.sflag [#allocation4], %s391_s10 }
 0x2cc   : > { %p513_p13 = pnand %p913_p10, %p821_p6 }
 0x2ce   : > { %p514_p11 = pneg %p513_p13 }
 0x2d0   : > { %705 = dma.done.wait (%p514_p11), %s392_s21, 128  }
 0x2d1   : > { %707 = vsyncadd (%p514_p11), %s392_s21, 4294967168  ;;  %p17_p0 = scmp.ge.s32.totalorder %s791_s4, 4   ;;  %s914_s12 = smov %s714_s13 }
 0x2d2   : > { %s915_s13 = smov %s718_s14  ;;  %s916_s14 = smov %s802_s7 }
 0x2d3   : > { %s917_s15 = smov %s791_s4  ;;  %19 = sbr.rel (!%p17_p0) target bundleno = 6 (0x6), region = 85 }
 0x2d8   :  { %398 = vsyncpa [#allocation3], 1 }
 0x2d9   :  { %400 = vsyncpa [#allocation3 + $0x1], 1 }
 0x2da   :  { %401 = vsyncpa [#allocation6], 1 }
 0x2db   :  { %402 = vsyncpa [#allocation4], 1 }
 0x2dc   :  { %404 = vsyncpa [#allocation4 + $0x1], 1 }

</bundles_post_ra>
